<compile_context>
chip_gen: v6e
topology: v6e:2x2x1
jax: 0.10.0
libtpu: 0.0.40
codegen_flags: <defaults>
</compile_context>

<pallas_src>
import jax
import jax.numpy as jnp
import numpy as np
from jax.experimental import pallas as pl
from jax.experimental.pallas import tpu as pltpu


def _round_up(v, m):
    return (v + m - 1) // m * m


def _largest_divisor(n, limit):
    """Largest divisor of n that is <= limit (always >= 1)."""
    limit = max(1, min(n, limit))
    for c in range(limit, 0, -1):
        if n % c == 0:
            return c
    return 1


# ---------------------------------------------------------------------------
# Pass 1: tanh(relu(logits)) L1-weighted pooling over N + fused context MLP
# ---------------------------------------------------------------------------
def _pool_context_kernel(lg_ref, x_ref,
                         w0at_ref, b0a_ref, w0b_ref, b0b_ref,
                         wcomb_ref, bcomb_ref, c1base_ref,
                         g_ref, c1_ref,
                         acc_ref, wsum_ref):
    j = pl.program_id(1)

    @pl.when(j == 0)
    def _init():
        acc_ref[...] = jnp.zeros_like(acc_ref)
        wsum_ref[...] = jnp.zeros_like(wsum_ref)

    # w = tanh(relu(logits)) in f32 (VPU + EUP).  Padded N positions hold 0
    # -> tanh(relu(0)) = 0 -> zero weight, so padding is inert.
    w = jnp.tanh(jnp.maximum(lg_ref[0].astype(jnp.float32), 0.0))          # (1, TN)
    x = x_ref[0].astype(jnp.float32)                                       # (Cp, TN)
    # Weighted pooling on the VPU (broadcast-multiply + lane reduction).
    acc_ref[...] += jnp.sum(x * w, axis=-1, keepdims=True)                 # (Cp, 1)
    wsum_ref[...] += jnp.sum(w, axis=-1, keepdims=True)                    # (1, 1)

    # Fused epilogue on the last N tile of this batch element: tiny channel MLP
    # (self.conv) + L2 normalization, plus the constant part of conv1's first
    # layer, emitted directly as a channel column.  All weights are tiny and
    # VMEM-resident -> no extra HBM traffic, no extra kernel launch.
    @pl.when(j == pl.num_programs(1) - 1)
    def _finalize():
        # L1 normalization of the weights (single per-batch scalar).
        pooled = acc_ref[...] / jnp.maximum(wsum_ref[...], 1e-12)          # (Cp, 1)
        # 1x1 conv C->I with folded BN, then ReLU (weight stored transposed).
        h0 = jnp.maximum(
            jnp.sum(w0at_ref[...] * pooled, axis=0, keepdims=True) + b0a_ref[...],
            0.0)                                                           # (1, Ip)
        # 1x1 conv I->C.
        y = jnp.sum(w0b_ref[...] * h0, axis=-1, keepdims=True) + b0b_ref[...]  # (Cp,1)
        # L2 normalize over channels -> global context g (channel column).
        nrm = jnp.sqrt(jnp.sum(y * y, axis=0, keepdims=True))              # (1, 1)
        inv = 1.0 / jnp.maximum(nrm, 1e-12)
        g_ref[0] = y * inv                                                 # (Cp, 1)
        # c1 = W1g_fold @ g + c1base = (W1g_fold@W0b) @ h0 * inv
        #      + (W1g_fold@b0b) * inv + c1base        -> directly a column.
        z = jnp.sum(wcomb_ref[...] * h0, axis=-1, keepdims=True) + bcomb_ref[...]
        c1_ref[0] = z * inv + c1base_ref[...]                              # (Cp, 1)


# ---------------------------------------------------------------------------
# Pass 2: orthogonal component + fused conv1 MLP (bf16 MXU) + residual add
# ---------------------------------------------------------------------------
def _orth_mlp_kernel(x_ref, g_ref, c1_ref, w1x_ref, w1b_ref, b1b_ref, o_ref):
    g = g_ref[0]                                                           # (Cp, 1) f32
    c1 = c1_ref[0]                                                         # (Cp, 1) f32
    x = x_ref[0].astype(jnp.float32)                                       # (Cp, TN)
    # proj_length[n] = <x[:, n], g>  (VPU mul + sublane reduction).
    plen = jnp.sum(x * g, axis=0, keepdims=True)                           # (1, TN)
    orth = (x - plen * g).astype(jnp.bfloat16)                             # (Cp, TN)
    # conv1: folded-BN 1x1 conv (orth half) -> ReLU -> 1x1 conv (bf16 MXU,
    # f32 accumulation).  Intermediates kept bf16 to cut VMEM live ranges.
    h1 = jnp.maximum(
        jnp.dot(w1x_ref[...], orth, preferred_element_type=jnp.float32) + c1,
        0.0).astype(jnp.bfloat16)                                          # (Cp, TN)
    y = jnp.dot(w1b_ref[...], h1, preferred_element_type=jnp.float32) + b1b_ref[...]
    # Re-read x for the residual so it need not stay live across both matmuls.
    o_ref[0] = (x_ref[0].astype(jnp.float32) + y).astype(o_ref.dtype)


# ---------------------------------------------------------------------------
# Wrapper
# ---------------------------------------------------------------------------
def global_context_forward(x, logits, params, *, bn_eps=1e-5, interpret=False):
    """GlobalContext forward.  x: (B, C, N), logits: (B, N) -> (B, C, N)."""
    B, C, N = x.shape
    f32 = jnp.float32
    bf16 = jnp.bfloat16
    I = params["conv0a_w"].shape[0]

    # ---- fold inference-mode BatchNorm into per-channel scale/shift ----------
    s0 = params["bn0_gamma"] / jnp.sqrt(params["bn0_var"] + bn_eps)
    t0 = params["bn0_beta"] - params["bn0_mean"] * s0
    s1 = params["bn1_gamma"] / jnp.sqrt(params["bn1_var"] + bn_eps)
    t1 = params["bn1_beta"] - params["bn1_mean"] * s1

    w0a_f = s0[:, None] * params["conv0a_w"]               # (I, C)
    b0a_f = s0 * params["conv0a_b"] + t0                   # (I,)
    w1x_f = s1[:, None] * params["conv1a_w"][:, :C]        # (C, C) acts on orth
    w1g_f = s1[:, None] * params["conv1a_w"][:, C:]        # (C, C) acts on g
    c1base = s1 * params["conv1a_b"] + t1                  # (C,)
    # Pre-combine so pass 1 can emit c1 as a channel column with no transpose:
    #   W1g_fold @ g = ((W1g_fold @ W0b) @ h0 + W1g_fold @ b0b) / ||y||
    wcomb = w1g_f @ params["conv0b_w"]                      # (C, I)
    bcomb = w1g_f @ params["conv0b_b"]                      # (C,)

    # ---- generation-aware VMEM / tile budget ----------------------------------
    itemsize = x.dtype.itemsize
    try:
        vmem_cap = int(getattr(pltpu.get_tpu_info(), "vmem_capacity_bytes",
                               64 * 1024 * 1024))
    except Exception:
        vmem_cap = 64 * 1024 * 1024                         # conservative (v7x)
    vmem_limit = int(min(max(vmem_cap // 2, 32 * 1024 * 1024), 64 * 1024 * 1024))
    tile_budget = (2 * 1024 * 1024 if vmem_cap <= 64 * 1024 * 1024
                   else 4 * 1024 * 1024)                    # bytes of x per tile

    # ---- padding / tiling ------------------------------------------------------
    Cp = _round_up(C, 8)                # channels live on sublanes
    Ip = _round_up(I, 8)
    m = _round_up(N, 128) // 128        # number of 128-lane blocks
    maxd = max(1, tile_budget // (128 * Cp * itemsize))

    # tn = 128*d where d divides the padded lane-block count; prefer exact
    # division of round_up(N,128); only add a little extra N padding if the
    # exact division would leave tiles far below the byte budget.
    d, mm = _largest_divisor(m, maxd), m
    if d < min(m, maxd) // 2:
        for extra in range(1, min(64, max(m // 8, 1)) + 1):
            cand = _largest_divisor(m + extra, maxd)
            if cand > d:
                d, mm = cand, m + extra
            if d >= min(m + extra, maxd):
                break
    tn = 128 * d
    Np = 128 * mm
    grid = (B, mm // d)

    needs_pad = (Cp != C) or (Np != N)
    lg = logits.astype(f32)
    if Np != N:
        lg = jnp.pad(lg, ((0, 0), (0, Np - N)))
    lgp = lg[:, None, :]                                              # (B, 1, Np)
    xp = (jnp.pad(x, ((0, 0), (0, Cp - C), (0, Np - N)))
          if needs_pad else x)                                        # (B, Cp, Np)

    def _pad2(a, r, c, dtype=f32):
        a = a.astype(f32)
        return jnp.pad(a, ((0, r - a.shape[0]), (0, c - a.shape[1]))).astype(dtype)

    w0at_p = _pad2(w0a_f.T, Cp, Ip)                  # (Cp, Ip)  BN folded
    b0a_p = _pad2(b0a_f[None, :], 1, Ip)             # (1, Ip)
    w0b_p = _pad2(params["conv0b_w"], Cp, Ip)        # (Cp, Ip)
    b0b_p = _pad2(params["conv0b_b"][:, None], Cp, 1)
    wcomb_p = _pad2(wcomb, Cp, Ip)
    bcomb_p = _pad2(bcomb[:, None], Cp, 1)
    c1base_p = _pad2(c1base[:, None], Cp, 1)
    w1x_p = _pad2(w1x_f, Cp, Cp, bf16)               # bf16 MXU weights (pass 2)
    w1b_p = _pad2(params["conv1b_w"], Cp, Cp, bf16)
    b1b_p = _pad2(params["conv1b_b"][:, None], Cp, 1)

    def const_spec(shape):
        return pl.BlockSpec(shape, lambda b, j: (0, 0))

    # ---- pass 1: weighted pooling over N + fused context MLP ------------------
    g_col, c1_col = pl.pallas_call(
        _pool_context_kernel,
        grid=grid,
        in_specs=[
            pl.BlockSpec((1, 1, tn), lambda b, j: (b, 0, j)),      # logits
            pl.BlockSpec((1, Cp, tn), lambda b, j: (b, 0, j)),     # x
            const_spec((Cp, Ip)),                                  # W0a^T (BN folded)
            const_spec((1, Ip)),                                   # b0a   (BN folded)
            const_spec((Cp, Ip)),                                  # W0b
            const_spec((Cp, 1)),                                   # b0b
            const_spec((Cp, Ip)),                                  # W1g_fold @ W0b
            const_spec((Cp, 1)),                                   # W1g_fold @ b0b
            const_spec((Cp, 1)),                                   # c1 base
        ],
        out_specs=[
            pl.BlockSpec((1, Cp, 1), lambda b, j: (b, 0, 0)),      # g  (column)
            pl.BlockSpec((1, Cp, 1), lambda b, j: (b, 0, 0)),      # c1 (column)
        ],
        out_shape=[
            jax.ShapeDtypeStruct((B, Cp, 1), f32),
            jax.ShapeDtypeStruct((B, Cp, 1), f32),
        ],
        scratch_shapes=[
            pltpu.VMEM((Cp, 1), f32),    # running weighted sum of x over N
            pltpu.VMEM((1, 1), f32),     # running sum of weights
        ],
        compiler_params=pltpu.CompilerParams(
            dimension_semantics=("parallel", "arbitrary"),
            vmem_limit_bytes=vmem_limit),
        cost_estimate=pl.CostEstimate(
            flops=3 * B * Np * Cp,
            transcendentals=B * Np,
            bytes_accessed=B * Cp * Np * itemsize + B * Np * 4),
        interpret=interpret,
    )(lgp, xp, w0at_p, b0a_p, w0b_p, b0b_p, wcomb_p, bcomb_p, c1base_p)

    # ---- pass 2: orthogonal component + conv1 MLP + residual add --------------
    out_p = pl.pallas_call(
        _orth_mlp_kernel,
        grid=grid,
        in_specs=[
            pl.BlockSpec((1, Cp, tn), lambda b, j: (b, 0, j)),     # x
            pl.BlockSpec((1, Cp, 1), lambda b, j: (b, 0, 0)),      # g
            pl.BlockSpec((1, Cp, 1), lambda b, j: (b, 0, 0)),      # c1
            const_spec((Cp, Cp)),                                  # W1x (BN folded, bf16)
            const_spec((Cp, Cp)),                                  # W1b (bf16)
            const_spec((Cp, 1)),                                   # b1b
        ],
        out_specs=pl.BlockSpec((1, Cp, tn), lambda b, j: (b, 0, j)),
        out_shape=jax.ShapeDtypeStruct((B, Cp, Np), x.dtype),
        # Overwrite the padded temp in place; when no padding exists the input
        # is the caller's x, so skip aliasing (would force an XLA copy).
        input_output_aliases=({0: 0} if needs_pad else {}),
        compiler_params=pltpu.CompilerParams(
            dimension_semantics=("parallel", "parallel"),
            vmem_limit_bytes=vmem_limit),
        cost_estimate=pl.CostEstimate(
            flops=4 * B * Np * Cp * Cp + 4 * B * Np * Cp,
            transcendentals=0,
            bytes_accessed=2 * B * Cp * Np * itemsize),
        interpret=interpret,
    )(xp, g_col, c1_col, w1x_p, w1b_p, b1b_p)

    if needs_pad:
        return out_p[:, :C, :N]
    return out_p


# ---------------------------------------------------------------------------
# Pure-JAX reference (inference-mode BN), mirroring the PyTorch forward.
# ---------------------------------------------------------------------------
def global_context_reference(x, logits, params, bn_eps=1e-5):
    w = jnp.tanh(jnp.maximum(logits, 0.0))[:, None, :]                    # (B,1,N)
    w = w / jnp.maximum(jnp.sum(jnp.abs(w), axis=2, keepdims=True), 1e-12)
    x_sum = jnp.sum(x * w, axis=2, keepdims=True)                         # (B,C,1)

    def conv1d(v, W, b):
        return jnp.einsum("oc,bcl->bol", W, v) + b[None, :, None]

    s0 = params["bn0_gamma"] / jnp.sqrt(params["bn0_var"] + bn_eps)
    t0 = params["bn0_beta"] - params["bn0_mean"] * s0
    y = conv1d(x_sum, params["conv0a_w"], params["conv0a_b"])
    y = s0[None, :, None] * y + t0[None, :, None]
    y = jnp.maximum(y, 0.0)
    y = conv1d(y, params["conv0b_w"], params["conv0b_b"])
    gc = y / jnp.maximum(jnp.linalg.norm(y, axis=1, keepdims=True), 1e-12)

    proj_len = jnp.einsum("bcn,bcl->bln", x, gc)                          # (B,1,N)
    orth = x - proj_len * gc
    cat = jnp.concatenate([orth, jnp.broadcast_to(gc, orth.shape)], axis=1)

    s1 = params["bn1_gamma"] / jnp.sqrt(params["bn1_var"] + bn_eps)
    t1 = params["bn1_beta"] - params["bn1_mean"] * s1
    z = jnp.einsum("oc,bcn->bon", params["conv1a_w"], cat) + params["conv1a_b"][None, :, None]
    z = s1[None, :, None] * z + t1[None, :, None]
    z = jnp.maximum(z, 0.0)
    z = jnp.einsum("oc,bcn->bon", params["conv1b_w"], z) + params["conv1b_b"][None, :, None]
    return x + z


if __name__ == "__main__":
    B, C, N, reduction = 2, 8, 16, 4
    I = C // reduction
    f32 = jnp.float32
    keys = jax.random.split(jax.random.PRNGKey(0), 18)

    x = jax.random.normal(keys[0], (B, C, N), dtype=f32)
    logits = jax.random.normal(keys[1], (B, N), dtype=f32)
    params = {
        "conv0a_w": 0.3 * jax.random.normal(keys[2], (I, C), f32),
        "conv0a_b": 0.1 * jax.random.normal(keys[3], (I,), f32),
        "bn0_gamma": 1.0 + 0.1 * jax.random.normal(keys[4], (I,), f32),
        "bn0_beta": 0.1 * jax.random.normal(keys[5], (I,), f32),
        "bn0_mean": 0.1 * jax.random.normal(keys[6], (I,), f32),
        "bn0_var": 1.0 + 0.1 * jnp.abs(jax.random.normal(keys[7], (I,), f32)),
        "conv0b_w": 0.3 * jax.random.normal(keys[8], (C, I), f32),
        "conv0b_b": 0.1 * jax.random.normal(keys[9], (C,), f32),
        "conv1a_w": 0.3 * jax.random.normal(keys[10], (C, 2 * C), f32),
        "conv1a_b": 0.1 * jax.random.normal(keys[11], (C,), f32),
        "bn1_gamma": 1.0 + 0.1 * jax.random.normal(keys[12], (C,), f32),
        "bn1_beta": 0.1 * jax.random.normal(keys[13], (C,), f32),
        "bn1_mean": 0.1 * jax.random.normal(keys[14], (C,), f32),
        "bn1_var": 1.0 + 0.1 * jnp.abs(jax.random.normal(keys[15], (C,), f32)),
        "conv1b_w": 0.3 * jax.random.normal(keys[16], (C, C), f32),
        "conv1b_b": 0.1 * jax.random.normal(keys[17], (C,), f32),
    }

    out = jax.jit(global_context_forward)(x, logits, params)
    out = jax.block_until_ready(out)

    ref = global_context_reference(x, logits, params)
    err = float(jnp.max(jnp.abs(out - ref)))
    if not (np.isfinite(err) and err < 5e-2):
        raise SystemExit(f"GlobalContext kernel mismatch: max abs err = {err}")
    print("KERNEL_OK")
</pallas_src>

<mosaic_0001>
module attributes {stable_mosaic.version = 11 : i64} {
  func.func @_pool_context_kernel(%arg0: i32, %arg1: i32, %arg2: memref<1x1x128xf32, #tpu.memory_space<vmem>>, %arg3: memref<1x8x128xf32, #tpu.memory_space<vmem>>, %arg4: memref<8x8xf32, #tpu.memory_space<vmem>>, %arg5: memref<1x8xf32, #tpu.memory_space<vmem>>, %arg6: memref<8x8xf32, #tpu.memory_space<vmem>>, %arg7: memref<8x1xf32, #tpu.memory_space<vmem>>, %arg8: memref<8x8xf32, #tpu.memory_space<vmem>>, %arg9: memref<8x1xf32, #tpu.memory_space<vmem>>, %arg10: memref<8x1xf32, #tpu.memory_space<vmem>>, %arg11: memref<1x8x1xf32, #tpu.memory_space<vmem>>, %arg12: memref<1x8x1xf32, #tpu.memory_space<vmem>>, %arg13: memref<8x1xf32, #tpu.memory_space<vmem>>, %arg14: memref<1x1xf32, #tpu.memory_space<vmem>>) attributes {dimension_semantics = [#tpu.dimension_semantics<parallel>, #tpu.dimension_semantics<arbitrary>], iteration_bounds = array<i64: 2, 1>, scalar_prefetch = 0 : i64, scratch_operands = 2 : i64, tpu.core_type = #tpu.core_type<tc>, window_params = [{transform_indices = @transform_0, window_bounds = array<i64: 1, 1, 128>}, {transform_indices = @transform_1, window_bounds = array<i64: 1, 8, 128>}, {pipeline_mode = #tpu.pipeline_mode<synchronous>, transform_indices = @transform_2, window_bounds = array<i64: 8, 8>}, {pipeline_mode = #tpu.pipeline_mode<synchronous>, transform_indices = @transform_3, window_bounds = array<i64: 1, 8>}, {pipeline_mode = #tpu.pipeline_mode<synchronous>, transform_indices = @transform_4, window_bounds = array<i64: 8, 8>}, {pipeline_mode = #tpu.pipeline_mode<synchronous>, transform_indices = @transform_5, window_bounds = array<i64: 8, 1>}, {pipeline_mode = #tpu.pipeline_mode<synchronous>, transform_indices = @transform_6, window_bounds = array<i64: 8, 8>}, {pipeline_mode = #tpu.pipeline_mode<synchronous>, transform_indices = @transform_7, window_bounds = array<i64: 8, 1>}, {pipeline_mode = #tpu.pipeline_mode<synchronous>, transform_indices = @transform_8, window_bounds = array<i64: 8, 1>}, {transform_indices = @transform_9, window_bounds = array<i64: 1, 8, 1>}, {transform_indices = @transform_10, window_bounds = array<i64: 1, 8, 1>}]} {
    %c0_i32 = arith.constant 0 : i32
    %0 = arith.cmpi eq, %arg1, %c0_i32 : i32
    %1 = arith.extui %0 : i1 to i32
    %c0_i32_0 = arith.constant 0 : i32
    %2 = arith.cmpi ne, %1, %c0_i32_0 : i32
    scf.if %2 {
      %cst_18 = arith.constant 0.000000e+00 : f32
      %25 = vector.broadcast %cst_18 : f32 to vector<8x1xf32>
      %c0_19 = arith.constant 0 : index
      %c0_20 = arith.constant 0 : index
      %26 = vector.load %arg13[%c0_19, %c0_20] : memref<8x1xf32, #tpu.memory_space<vmem>>, vector<8x1xf32>
      tpu.vector_store %arg13[%c0_19, %c0_20], %25 {strides = array<i32>} : memref<8x1xf32, #tpu.memory_space<vmem>>, vector<8x1xf32>,
      %cst_21 = arith.constant 0.000000e+00 : f32
      %27 = vector.broadcast %cst_21 : f32 to vector<1x1xf32>
      %c0_22 = arith.constant 0 : index
      %c0_23 = arith.constant 0 : index
      %28 = vector.load %arg14[%c0_22, %c0_23] : memref<1x1xf32, #tpu.memory_space<vmem>>, vector<1x1xf32>
      tpu.vector_store %arg14[%c0_22, %c0_23], %27 {strides = array<i32>} : memref<1x1xf32, #tpu.memory_space<vmem>>, vector<1x1xf32>,
    } else {
    }
    %c0 = arith.constant 0 : index
    %c0_1 = arith.constant 0 : index
    %c0_2 = arith.constant 0 : index
    %3 = vector.load %arg2[%c0, %c0_1, %c0_2] : memref<1x1x128xf32, #tpu.memory_space<vmem>>, vector<1x1x128xf32>
    %4 = vector.shape_cast %3 : vector<1x1x128xf32> to vector<1x128xf32>
    %cst = arith.constant 0.000000e+00 : f32
    %5 = vector.broadcast %cst : f32 to vector<1x128xf32>
    %6 = arith.maximumf %4, %5 : vector<1x128xf32>
    %7 = math.tanh %6 : vector<1x128xf32>
    %c0_3 = arith.constant 0 : index
    %c0_4 = arith.constant 0 : index
    %c0_5 = arith.constant 0 : index
    %8 = vector.load %arg3[%c0_3, %c0_4, %c0_5] : memref<1x8x128xf32, #tpu.memory_space<vmem>>, vector<1x8x128xf32>
    %9 = vector.shape_cast %8 : vector<1x8x128xf32> to vector<8x128xf32>
    %c0_6 = arith.constant 0 : index
    %c0_7 = arith.constant 0 : index
    %10 = vector.load %arg13[%c0_6, %c0_7] : memref<8x1xf32, #tpu.memory_space<vmem>>, vector<8x1xf32>
    %11 = vector.broadcast %7 : vector<1x128xf32> to vector<8x128xf32>
    %12 = arith.mulf %9, %11 : vector<8x128xf32>
    %cst_8 = arith.constant dense<0.000000e+00> : vector<8xf32>
    %13 = vector.multi_reduction <add>, %12, %cst_8 [1] : vector<8x128xf32> to vector<8xf32>
    %14 = vector.shape_cast %13 : vector<8xf32> to vector<8x1xf32>
    %15 = arith.addf %10, %14 : vector<8x1xf32>
    %c0_9 = arith.constant 0 : index
    %c0_10 = arith.constant 0 : index
    %16 = vector.load %arg13[%c0_9, %c0_10] : memref<8x1xf32, #tpu.memory_space<vmem>>, vector<8x1xf32>
    tpu.vector_store %arg13[%c0_9, %c0_10], %15 {strides = array<i32>} : memref<8x1xf32, #tpu.memory_space<vmem>>, vector<8x1xf32>,
    %c0_11 = arith.constant 0 : index
    %c0_12 = arith.constant 0 : index
    %17 = vector.load %arg14[%c0_11, %c0_12] : memref<1x1xf32, #tpu.memory_space<vmem>>, vector<1x1xf32>
    %cst_13 = arith.constant dense<0.000000e+00> : vector<1xf32>
    %18 = vector.multi_reduction <add>, %7, %cst_13 [1] : vector<1x128xf32> to vector<1xf32>
    %19 = vector.shape_cast %18 : vector<1xf32> to vector<1x1xf32>
    %20 = arith.addf %17, %19 : vector<1x1xf32>
    %c0_14 = arith.constant 0 : index
    %c0_15 = arith.constant 0 : index
    %21 = vector.load %arg14[%c0_14, %c0_15] : memref<1x1xf32, #tpu.memory_space<vmem>>, vector<1x1xf32>
    tpu.vector_store %arg14[%c0_14, %c0_15], %20 {strides = array<i32>} : memref<1x1xf32, #tpu.memory_space<vmem>>, vector<1x1xf32>,
    %c0_i32_16 = arith.constant 0 : i32
    %22 = arith.cmpi eq, %arg1, %c0_i32_16 : i32
    %23 = arith.extui %22 : i1 to i32
    %c0_i32_17 = arith.constant 0 : i32
    %24 = arith.cmpi ne, %23, %c0_i32_17 : i32
    scf.if %24 {
      %c0_18 = arith.constant 0 : index
      %c0_19 = arith.constant 0 : index
      %25 = vector.load %arg13[%c0_18, %c0_19] : memref<8x1xf32, #tpu.memory_space<vmem>>, vector<8x1xf32>
      %c0_20 = arith.constant 0 : index
      %c0_21 = arith.constant 0 : index
      %26 = vector.load %arg14[%c0_20, %c0_21] : memref<1x1xf32, #tpu.memory_space<vmem>>, vector<1x1xf32>
      %cst_22 = arith.constant 9.99999996E-13 : f32
      %27 = vector.broadcast %cst_22 : f32 to vector<1x1xf32>
      %28 = arith.maximumf %26, %27 : vector<1x1xf32>
      %29 = vector.broadcast %28 : vector<1x1xf32> to vector<8x1xf32>
      %30 = arith.divf %25, %29 : vector<8x1xf32>
      %c0_23 = arith.constant 0 : index
      %c0_24 = arith.constant 0 : index
      %31 = vector.load %arg4[%c0_23, %c0_24] : memref<8x8xf32, #tpu.memory_space<vmem>>, vector<8x8xf32>
      %32 = vector.broadcast %30 : vector<8x1xf32> to vector<8x8xf32>
      %33 = arith.mulf %31, %32 : vector<8x8xf32>
      %cst_25 = arith.constant dense<0.000000e+00> : vector<8xf32>
      %34 = vector.multi_reduction <add>, %33, %cst_25 [0] : vector<8x8xf32> to vector<8xf32>
      %35 = vector.shape_cast %34 : vector<8xf32> to vector<1x8xf32>
      %c0_26 = arith.constant 0 : index
      %c0_27 = arith.constant 0 : index
      %36 = vector.load %arg5[%c0_26, %c0_27] : memref<1x8xf32, #tpu.memory_space<vmem>>, vector<1x8xf32>
      %37 = arith.addf %35, %36 : vector<1x8xf32>
      %cst_28 = arith.constant 0.000000e+00 : f32
      %38 = vector.broadcast %cst_28 : f32 to vector<1x8xf32>
      %39 = arith.maximumf %37, %38 : vector<1x8xf32>
      %c0_29 = arith.constant 0 : index
      %c0_30 = arith.constant 0 : index
      %40 = vector.load %arg6[%c0_29, %c0_30] : memref<8x8xf32, #tpu.memory_space<vmem>>, vector<8x8xf32>
      %41 = vector.broadcast %39 : vector<1x8xf32> to vector<8x8xf32>
      %42 = arith.mulf %40, %41 : vector<8x8xf32>
      %cst_31 = arith.constant dense<0.000000e+00> : vector<8xf32>
      %43 = vector.multi_reduction <add>, %42, %cst_31 [1] : vector<8x8xf32> to vector<8xf32>
      %44 = vector.shape_cast %43 : vector<8xf32> to vector<8x1xf32>
      %c0_32 = arith.constant 0 : index
      %c0_33 = arith.constant 0 : index
      %45 = vector.load %arg7[%c0_32, %c0_33] : memref<8x1xf32, #tpu.memory_space<vmem>>, vector<8x1xf32>
      %46 = arith.addf %44, %45 : vector<8x1xf32>
      %47 = arith.mulf %46, %46 : vector<8x1xf32>
      %cst_34 = arith.constant dense<0.000000e+00> : vector<1xf32>
      %48 = vector.multi_reduction <add>, %47, %cst_34 [0] : vector<8x1xf32> to vector<1xf32>
      %49 = vector.shape_cast %48 : vector<1xf32> to vector<1x1xf32>
      %50 = math.sqrt %49 : vector<1x1xf32>
      %cst_35 = arith.constant 9.99999996E-13 : f32
      %51 = vector.broadcast %cst_35 : f32 to vector<1x1xf32>
      %52 = arith.maximumf %50, %51 : vector<1x1xf32>
      %cst_36 = arith.constant 1.000000e+00 : f32
      %53 = vector.broadcast %cst_36 : f32 to vector<1x1xf32>
      %54 = arith.divf %53, %52 : vector<1x1xf32>
      %55 = vector.broadcast %54 : vector<1x1xf32> to vector<8x1xf32>
      %56 = arith.mulf %46, %55 : vector<8x1xf32>
      %c0_37 = arith.constant 0 : index
      %c0_38 = arith.constant 0 : index
      %c0_39 = arith.constant 0 : index
      %57 = vector.load %arg11[%c0_37, %c0_38, %c0_39] : memref<1x8x1xf32, #tpu.memory_space<vmem>>, vector<1x8x1xf32>
      %58 = vector.shape_cast %57 : vector<1x8x1xf32> to vector<8x1xf32>
      %59 = vector.shape_cast %56 : vector<8x1xf32> to vector<1x8x1xf32>
      tpu.vector_store %arg11[%c0_37, %c0_38, %c0_39], %59 {strides = array<i32>} : memref<1x8x1xf32, #tpu.memory_space<vmem>>, vector<1x8x1xf32>,
      %c0_40 = arith.constant 0 : index
      %c0_41 = arith.constant 0 : index
      %60 = vector.load %arg8[%c0_40, %c0_41] : memref<8x8xf32, #tpu.memory_space<vmem>>, vector<8x8xf32>
      %61 = vector.broadcast %39 : vector<1x8xf32> to vector<8x8xf32>
      %62 = arith.mulf %60, %61 : vector<8x8xf32>
      %cst_42 = arith.constant dense<0.000000e+00> : vector<8xf32>
      %63 = vector.multi_reduction <add>, %62, %cst_42 [1] : vector<8x8xf32> to vector<8xf32>
      %64 = vector.shape_cast %63 : vector<8xf32> to vector<8x1xf32>
      %c0_43 = arith.constant 0 : index
      %c0_44 = arith.constant 0 : index
      %65 = vector.load %arg9[%c0_43, %c0_44] : memref<8x1xf32, #tpu.memory_space<vmem>>, vector<8x1xf32>
      %66 = arith.addf %64, %65 : vector<8x1xf32>
      %67 = vector.broadcast %54 : vector<1x1xf32> to vector<8x1xf32>
      %68 = arith.mulf %66, %67 : vector<8x1xf32>
      %c0_45 = arith.constant 0 : index
      %c0_46 = arith.constant 0 : index
      %69 = vector.load %arg10[%c0_45, %c0_46] : memref<8x1xf32, #tpu.memory_space<vmem>>, vector<8x1xf32>
      %70 = arith.addf %68, %69 : vector<8x1xf32>
      %c0_47 = arith.constant 0 : index
      %c0_48 = arith.constant 0 : index
      %c0_49 = arith.constant 0 : index
      %71 = vector.load %arg12[%c0_47, %c0_48, %c0_49] : memref<1x8x1xf32, #tpu.memory_space<vmem>>, vector<1x8x1xf32>
      %72 = vector.shape_cast %71 : vector<1x8x1xf32> to vector<8x1xf32>
      %73 = vector.shape_cast %70 : vector<8x1xf32> to vector<1x8x1xf32>
      tpu.vector_store %arg12[%c0_47, %c0_48, %c0_49], %73 {strides = array<i32>} : memref<1x8x1xf32, #tpu.memory_space<vmem>>, vector<1x8x1xf32>,
    } else {
    }
    return
  }
  func.func @transform_0(%arg0: i32, %arg1: i32) -> (i32, i32, i32) {
    %c0_i32 = arith.constant 0 : i32
    %c0_i32_0 = arith.constant 0 : i32
    return %arg0, %c0_i32, %arg1 : i32, i32, i32
  }
  func.func @transform_1(%arg0: i32, %arg1: i32) -> (i32, i32, i32) {
    %c0_i32 = arith.constant 0 : i32
    %c0_i32_0 = arith.constant 0 : i32
    return %arg0, %c0_i32, %arg1 : i32, i32, i32
  }
  func.func @transform_2(%arg0: i32, %arg1: i32) -> (i32, i32) {
    %c0_i32 = arith.constant 0 : i32
    %c0_i32_0 = arith.constant 0 : i32
    %c0_i32_1 = arith.constant 0 : i32
    return %c0_i32, %c0_i32_0 : i32, i32
  }
  func.func @transform_3(%arg0: i32, %arg1: i32) -> (i32, i32) {
    %c0_i32 = arith.constant 0 : i32
    %c0_i32_0 = arith.constant 0 : i32
    %c0_i32_1 = arith.constant 0 : i32
    return %c0_i32, %c0_i32_0 : i32, i32
  }
  func.func @transform_4(%arg0: i32, %arg1: i32) -> (i32, i32) {
    %c0_i32 = arith.constant 0 : i32
    %c0_i32_0 = arith.constant 0 : i32
    %c0_i32_1 = arith.constant 0 : i32
    return %c0_i32, %c0_i32_0 : i32, i32
  }
  func.func @transform_5(%arg0: i32, %arg1: i32) -> (i32, i32) {
    %c0_i32 = arith.constant 0 : i32
    %c0_i32_0 = arith.constant 0 : i32
    %c0_i32_1 = arith.constant 0 : i32
    return %c0_i32, %c0_i32_0 : i32, i32
  }
  func.func @transform_6(%arg0: i32, %arg1: i32) -> (i32, i32) {
    %c0_i32 = arith.constant 0 : i32
    %c0_i32_0 = arith.constant 0 : i32
    %c0_i32_1 = arith.constant 0 : i32
    return %c0_i32, %c0_i32_0 : i32, i32
  }
  func.func @transform_7(%arg0: i32, %arg1: i32) -> (i32, i32) {
    %c0_i32 = arith.constant 0 : i32
    %c0_i32_0 = arith.constant 0 : i32
    %c0_i32_1 = arith.constant 0 : i32
    return %c0_i32, %c0_i32_0 : i32, i32
  }
  func.func @transform_8(%arg0: i32, %arg1: i32) -> (i32, i32) {
    %c0_i32 = arith.constant 0 : i32
    %c0_i32_0 = arith.constant 0 : i32
    %c0_i32_1 = arith.constant 0 : i32
    return %c0_i32, %c0_i32_0 : i32, i32
  }
  func.func @transform_9(%arg0: i32, %arg1: i32) -> (i32, i32, i32) {
    %c0_i32 = arith.constant 0 : i32
    %c0_i32_0 = arith.constant 0 : i32
    %c0_i32_1 = arith.constant 0 : i32
    return %arg0, %c0_i32, %c0_i32_0 : i32, i32, i32
  }
  func.func @transform_10(%arg0: i32, %arg1: i32) -> (i32, i32, i32) {
    %c0_i32 = arith.constant 0 : i32
    %c0_i32_0 = arith.constant 0 : i32
    %c0_i32_1 = arith.constant 0 : i32
    return %arg0, %c0_i32, %c0_i32_0 : i32, i32, i32
  }
}

module attributes {stable_mosaic.version = 11 : i64} {
  func.func @_orth_mlp_kernel(%arg0: i32, %arg1: i32, %arg2: memref<1x8x128xf32, #tpu.memory_space<vmem>>, %arg3: memref<1x8x1xf32, #tpu.memory_space<vmem>>, %arg4: memref<1x8x1xf32, #tpu.memory_space<vmem>>, %arg5: memref<8x8xbf16, #tpu.memory_space<vmem>>, %arg6: memref<8x8xbf16, #tpu.memory_space<vmem>>, %arg7: memref<8x1xf32, #tpu.memory_space<vmem>>, %arg8: memref<1x8x128xf32, #tpu.memory_space<vmem>>) attributes {dimension_semantics = [#tpu.dimension_semantics<parallel>, #tpu.dimension_semantics<parallel>], iteration_bounds = array<i64: 2, 1>, scalar_prefetch = 0 : i64, scratch_operands = 0 : i64, tpu.core_type = #tpu.core_type<tc>, window_params = [{transform_indices = @transform_0, window_bounds = array<i64: 1, 8, 128>}, {transform_indices = @transform_1, window_bounds = array<i64: 1, 8, 1>}, {transform_indices = @transform_2, window_bounds = array<i64: 1, 8, 1>}, {pipeline_mode = #tpu.pipeline_mode<synchronous>, transform_indices = @transform_3, window_bounds = array<i64: 8, 8>}, {pipeline_mode = #tpu.pipeline_mode<synchronous>, transform_indices = @transform_4, window_bounds = array<i64: 8, 8>}, {pipeline_mode = #tpu.pipeline_mode<synchronous>, transform_indices = @transform_5, window_bounds = array<i64: 8, 1>}, {transform_indices = @transform_6, window_bounds = array<i64: 1, 8, 128>}]} {
    %c0 = arith.constant 0 : index
    %c0_0 = arith.constant 0 : index
    %c0_1 = arith.constant 0 : index
    %0 = vector.load %arg3[%c0, %c0_0, %c0_1] : memref<1x8x1xf32, #tpu.memory_space<vmem>>, vector<1x8x1xf32>
    %1 = vector.shape_cast %0 : vector<1x8x1xf32> to vector<8x1xf32>
    %c0_2 = arith.constant 0 : index
    %c0_3 = arith.constant 0 : index
    %c0_4 = arith.constant 0 : index
    %2 = vector.load %arg4[%c0_2, %c0_3, %c0_4] : memref<1x8x1xf32, #tpu.memory_space<vmem>>, vector<1x8x1xf32>
    %3 = vector.shape_cast %2 : vector<1x8x1xf32> to vector<8x1xf32>
    %c0_5 = arith.constant 0 : index
    %c0_6 = arith.constant 0 : index
    %c0_7 = arith.constant 0 : index
    %4 = vector.load %arg2[%c0_5, %c0_6, %c0_7] : memref<1x8x128xf32, #tpu.memory_space<vmem>>, vector<1x8x128xf32>
    %5 = vector.shape_cast %4 : vector<1x8x128xf32> to vector<8x128xf32>
    %6 = vector.broadcast %1 : vector<8x1xf32> to vector<8x128xf32>
    %7 = arith.mulf %5, %6 : vector<8x128xf32>
    %cst = arith.constant dense<0.000000e+00> : vector<128xf32>
    %8 = vector.multi_reduction <add>, %7, %cst [0] : vector<8x128xf32> to vector<128xf32>
    %9 = vector.shape_cast %8 : vector<128xf32> to vector<1x128xf32>
    %10 = vector.broadcast %9 : vector<1x128xf32> to vector<8x128xf32>
    %11 = vector.broadcast %1 : vector<8x1xf32> to vector<8x128xf32>
    %12 = arith.mulf %10, %11 : vector<8x128xf32>
    %13 = arith.subf %5, %12 : vector<8x128xf32>
    %14 = arith.truncf %13 : vector<8x128xf32> to vector<8x128xbf16>
    %c0_8 = arith.constant 0 : index
    %c0_9 = arith.constant 0 : index
    %15 = vector.load %arg5[%c0_8, %c0_9] : memref<8x8xbf16, #tpu.memory_space<vmem>>, vector<8x8xbf16>
    %cst_10 = arith.constant dense<0.000000e+00> : vector<8x128xf32>
    %16 = tpu.matmul %15, %14, %cst_10 {dimension_numbers = #tpu.dot_dimension_numbers<[1], [0], [0], [1], [0, 0, 1, 1], [], []>} : vector<8x8xbf16>, vector<8x128xbf16>, vector<8x128xf32> -> vector<8x128xf32>
    %17 = vector.broadcast %3 : vector<8x1xf32> to vector<8x128xf32>
    %18 = arith.addf %16, %17 : vector<8x128xf32>
    %cst_11 = arith.constant 0.000000e+00 : f32
    %19 = vector.broadcast %cst_11 : f32 to vector<8x128xf32>
    %20 = arith.maximumf %18, %19 : vector<8x128xf32>
    %21 = arith.truncf %20 : vector<8x128xf32> to vector<8x128xbf16>
    %c0_12 = arith.constant 0 : index
    %c0_13 = arith.constant 0 : index
    %22 = vector.load %arg6[%c0_12, %c0_13] : memref<8x8xbf16, #tpu.memory_space<vmem>>, vector<8x8xbf16>
    %cst_14 = arith.constant dense<0.000000e+00> : vector<8x128xf32>
    %23 = tpu.matmul %22, %21, %cst_14 {dimension_numbers = #tpu.dot_dimension_numbers<[1], [0], [0], [1], [0, 0, 1, 1], [], []>} : vector<8x8xbf16>, vector<8x128xbf16>, vector<8x128xf32> -> vector<8x128xf32>
    %c0_15 = arith.constant 0 : index
    %c0_16 = arith.constant 0 : index
    %24 = vector.load %arg7[%c0_15, %c0_16] : memref<8x1xf32, #tpu.memory_space<vmem>>, vector<8x1xf32>
    %25 = vector.broadcast %24 : vector<8x1xf32> to vector<8x128xf32>
    %26 = arith.addf %23, %25 : vector<8x128xf32>
    %c0_17 = arith.constant 0 : index
    %c0_18 = arith.constant 0 : index
    %c0_19 = arith.constant 0 : index
    %27 = vector.load %arg2[%c0_17, %c0_18, %c0_19] : memref<1x8x128xf32, #tpu.memory_space<vmem>>, vector<1x8x128xf32>
    %28 = vector.shape_cast %27 : vector<1x8x128xf32> to vector<8x128xf32>
    %29 = arith.addf %28, %26 : vector<8x128xf32>
    %c0_20 = arith.constant 0 : index
    %c0_21 = arith.constant 0 : index
    %c0_22 = arith.constant 0 : index
    %30 = vector.load %arg8[%c0_20, %c0_21, %c0_22] : memref<1x8x128xf32, #tpu.memory_space<vmem>>, vector<1x8x128xf32>
    %31 = vector.shape_cast %30 : vector<1x8x128xf32> to vector<8x128xf32>
    %32 = vector.shape_cast %29 : vector<8x128xf32> to vector<1x8x128xf32>
    tpu.vector_store %arg8[%c0_20, %c0_21, %c0_22], %32 {strides = array<i32>} : memref<1x8x128xf32, #tpu.memory_space<vmem>>, vector<1x8x128xf32>,
    return
  }
  func.func @transform_0(%arg0: i32, %arg1: i32) -> (i32, i32, i32) {
    %c0_i32 = arith.constant 0 : i32
    %c0_i32_0 = arith.constant 0 : i32
    return %arg0, %c0_i32, %arg1 : i32, i32, i32
  }
  func.func @transform_1(%arg0: i32, %arg1: i32) -> (i32, i32, i32) {
    %c0_i32 = arith.constant 0 : i32
    %c0_i32_0 = arith.constant 0 : i32
    %c0_i32_1 = arith.constant 0 : i32
    return %arg0, %c0_i32, %c0_i32_0 : i32, i32, i32
  }
  func.func @transform_2(%arg0: i32, %arg1: i32) -> (i32, i32, i32) {
    %c0_i32 = arith.constant 0 : i32
    %c0_i32_0 = arith.constant 0 : i32
    %c0_i32_1 = arith.constant 0 : i32
    return %arg0, %c0_i32, %c0_i32_0 : i32, i32, i32
  }
  func.func @transform_3(%arg0: i32, %arg1: i32) -> (i32, i32) {
    %c0_i32 = arith.constant 0 : i32
    %c0_i32_0 = arith.constant 0 : i32
    %c0_i32_1 = arith.constant 0 : i32
    return %c0_i32, %c0_i32_0 : i32, i32
  }
  func.func @transform_4(%arg0: i32, %arg1: i32) -> (i32, i32) {
    %c0_i32 = arith.constant 0 : i32
    %c0_i32_0 = arith.constant 0 : i32
    %c0_i32_1 = arith.constant 0 : i32
    return %c0_i32, %c0_i32_0 : i32, i32
  }
  func.func @transform_5(%arg0: i32, %arg1: i32) -> (i32, i32) {
    %c0_i32 = arith.constant 0 : i32
    %c0_i32_0 = arith.constant 0 : i32
    %c0_i32_1 = arith.constant 0 : i32
    return %c0_i32, %c0_i32_0 : i32, i32
  }
  func.func @transform_6(%arg0: i32, %arg1: i32) -> (i32, i32, i32) {
    %c0_i32 = arith.constant 0 : i32
    %c0_i32_0 = arith.constant 0 : i32
    return %arg0, %c0_i32, %arg1 : i32, i32, i32
  }
}

</mosaic_0001>

<bundles_post_ra>
// kernel: global_context_forward.2
= control target key start
LH: loop header
LB: loop body
LE: loop exit
PB: predicated region body
PF: predicated region fallthrough
CT: control target
= control target key end

     0   :  { %s755_s13 = smov 0   ;;  %s757_s14 = smov 0   ;;  %s830_s0 = inlined_call_operand.vmem [shape: f32[2,1,128], index: 0, kind: input, shape index: {}]   ;;  %s831_s1 = inlined_call_operand.vmem [shape: f32[2,8,128], index: 1, kind: input, shape index: {}]   ;;  %s832_s2 = inlined_call_operand.vmem [shape: f32[8,8], index: 2, kind: input, shape index: {}]   ;;  %s833_s3 = inlined_call_operand.vmem [shape: f32[1,8], index: 3, kind: input, shape index: {}]   ;;  %s834_s4 = inlined_call_operand.vmem [shape: f32[8,8], index: 4, kind: input, shape index: {}]   ;;  %s835_s5 = inlined_call_operand.vmem [shape: f32[8,1], index: 5, kind: input, shape index: {}]   ;;  %s836_s6 = inlined_call_operand.vmem [shape: f32[8,8], index: 6, kind: input, shape index: {}]   ;;  %s837_s7 = inlined_call_operand.vmem [shape: f32[8,1], index: 7, kind: input, shape index: {}]   ;;  %s838_s8 = inlined_call_operand.vmem [shape: f32[8,1], index: 8, kind: input, shape index: {}]   ;;  %s839_s9 = inlined_call_operand.vmem [shape: f32[2,8,1], index: 9, kind: output, shape index: {0}]   ;;  %s840_s10 = inlined_call_operand.vmem [shape: f32[2,8,1], index: 10, kind: output, shape index: {1}]  }
   0x1   :  { %s759_s15 = smov 0  }
   0x2 LB: > { %s33_s16 = sadd.s32 1, %s692_s14  ;;  %p632_p0 = scmp.ge.s32.totalorder %s696_s15, 1  ;;  %s696_s15 = sphi %s759_s15, %s21_s15   ;;  %s692_s14 = sphi %s757_s14, %s842_s14   ;;  %s688_s13 = sphi %s755_s13, %s841_s13  }
   0x3   : > { %p35_p1 = scmp.ge.s32.totalorder %s33_s16, 2  ;;  %p344_p2 = scmp.lt.s32.totalorder %s696_s15, 3 }
   0x5   : > { %s844_s16 = smov (%p35_p1, %s33_s16), 0  ;;  %p345_p3 = pnand %p632_p0, %p344_p2 }
   0x6   : > { %p393_p4 = scmp.lt.s32.totalorder (!%p345_p3), %s688_s13, 1 }
   0x7   : > { %348 = sbr.rel (%p345_p3) target bundleno = 542 (0x21e), region = 56 }
   0xc   : > { %vm420_vm0 = vcmask 0   ;;  %v698_v0 = vmov 0.0   ;;  %s846_s13 = smov (!%p393_p4, %s688_s13), 1  ;;  %v428_v3 = vlaneseq  ;;  %vm440_vm1 = vcmask 1040384   ;;  %v461_v24 = vld [vmem:[%s832_s2] sm:$0xff] }
   0xd   : > { %421 = vst.msk [vmem:[#allocation3] sm:$0x1] %vm420_vm0, %v698_v0  ;;  %s398_s19 = scalar_lea.vmem %s830_s0, %s846_s13  ;;  %s777_s20 = sshll.u32 %s846_s13, 3  ;;  %vm418_vm2 = vcmask 7168   ;;  %v699_v11 = vmov 0   ;;  %vm468_vm3 = vcmask 64512  }
   0xe   : > { %v422_v1 = vld [vmem:[%s398_s19] sm:$0x1]  ;;  %v429_v4 = vshrl.u32 %v428_v3, 7  ;;  %s405_s23 = scalar_lea.vmem %s831_s1, %s777_s20  ;;  %419 = vst.msk [vmem:[#allocation2] sm:$0xff] %vm418_vm2, %v698_v0  ;;  %664 = vset.pattern.permute.xlu1 %v699_v11  ;;  %665 = vset.pattern.permute.xlu0 %v699_v11  ;;  %s409_s22 = scalar_lea.vmem %s839_s9, %s777_s20 }
   0xf   : > { %v423_v2 = vmax.f32 %v422_v1, 0.0  ;;  %v425_v7 = vld [vmem:[%s405_s23] sm:$0xff]  ;;  %s413_s27 = scalar_lea.vmem %s840_s10, %s777_s20 }
  0x10   : > { %v430_v5 = vsub.s32 0, %v429_v4  ;;  %v476_v33 = vld [vmem:[%s833_s3] sm:$0x1] }
  0x11   : > { %666 = vtanh.f32 %v423_v2  ;;  %v510_v37 = vld [vmem:[%s836_s6] sm:$0xff] }
  0x12   : > { %v479_v38 = vld [vmem:[%s834_s4] sm:$0xff] }
  0x13   : > { %v488_v44 = vld [vmem:[%s835_s5] sm:$0xff] }
  0x14   : > { %v439_v12 = vld [vmem:[#allocation3] sm:$0x1]  ;;  %v515_v61 = vld [vmem:[%s837_s7] sm:$0xff] }
  0x15   : > { %v426_v15 = vld [vmem:[#allocation2] sm:$0xff] }
  0x16   : > { %v518_v1 = vld [vmem:[%s838_s8] sm:$0xff] }
  0x1e   : > { %v667_v6 = vpop.eup %666 }
  0x1f   : > { %v441_v8 = vsel %vm440_vm1, %v667_v6, 0.0  ;;  %v431_v9 = vrot.slane %v667_v6, %v430_v5 }
  0x20   : > { %442 = vadd.xlane.f32.xlu0 %v441_v8 }
  0x21   : > { %v433_v10 = vmul.f32 %v431_v9, %v425_v7 }
  0x24   : > { %434 = vadd.xlane.f32.xlu0 %v433_v10 }
  0xa9   : > { %v443_v13 = vpop.xlane.xlu0 %442 }
  0xaa   : > { %v444_v14 = vadd.f32 %v443_v13, %v439_v12 }
  0xac   : > { %446 = vst.msk [vmem:[#allocation3] sm:$0x1] %vm420_vm0, %v444_v14 }
  0xad   : > { %v435_v16 = vpop.xlane.xlu0 %434 }
  0xae   : > { %v436_v17 = vadd.f32 %v435_v16, %v426_v15 }
  0xb0   : > { %438 = vst.msk [vmem:[#allocation2] sm:$0xff] %vm418_vm2, %v436_v17 }
  0xb3   : > { %v451_v18 = vld [vmem:[#allocation3] sm:$0x1] }
  0xb4   : > { %v452_v19 = vmax.f32 %v451_v18, 1e-12 }
  0xb6   : > { %v457_v20 = vrot.slane %v452_v19, %v430_v5 }
  0xb7   : > { %v450_v21 = vld [vmem:[#allocation2] sm:$0xff] }
  0xb8   : > { %668 = vrcp.f32 %v457_v20 }
  0xc5   : > { %v669_v22 = vpop.eup %668 }
  0xc6   : > { %v460_v23 = vmul.f32 %v669_v22, %v450_v21 }
  0xc8   : > { %464 = vperm.xlu1 %664, %v460_v23  }
 0x143   : > { %v465_v25 = vpop.permute.xlu1 %464 }
 0x144   : > { %v467_v26 = vmul.f32 %v465_v25, %v461_v24 }
 0x146   : > { %v469_v27 = vsel %vm468_vm3, %v467_v26, 0.0 }
 0x147   : > { %v470_v28 = vrot.slane %v469_v27, 4 }
 0x149   : > { %v471_v29 = vadd.f32 %v470_v28, %v469_v27 }
 0x14b   : > { %v472_v30 = vrot.slane %v471_v29, 2 }
 0x14d   : > { %v473_v31 = vadd.f32 %v472_v30, %v471_v29 }
 0x14f   : > { %v474_v32 = vrot.slane %v473_v31, 1 }
 0x151   : > { %v475_v34 = vadd.f32 %v474_v32, %v473_v31 }
 0x153   : > { %v477_v35 = vadd.f32 %v476_v33, %v475_v34 }
 0x155   : > { %v478_v36 = vmax.f32 %v477_v35, 0.0 }
 0x157   : > { %v483_v39 = vrot.slane %v478_v36, %v430_v5 }
 0x159   : > { %v511_v40 = vmul.f32 %v510_v37, %v483_v39  ;;  %v484_v41 = vmul.f32 %v483_v39, %v479_v38 }
 0x15b   : > { %v512_v42 = vsel %vm468_vm3, %v511_v40, 0.0  ;;  %v485_v43 = vsel %vm468_vm3, %v484_v41, 0.0 }
 0x15c   : > { %513 = vadd.xlane.f32.xlu0 %v512_v42  ;;  %486 = vadd.xlane.f32.xlu1 %v485_v43 }
 0x1e5   : > { %v487_v45 = vpop.xlane.xlu1 %486  ;;  %v514_v62 = vpop.xlane.xlu0 %513 }
 0x1e6   : > { %v489_v46 = vadd.f32 %v488_v44, %v487_v45  ;;  %v516_v63 = vadd.f32 %v515_v61, %v514_v62 }
 0x1e8   : > { %v490_v47 = vmul.f32 %v489_v46, %v489_v46 }
 0x1ea   : > { %v491_v48 = vsel %vm418_vm2, %v490_v47, 0.0 }
 0x1eb   : > { %v492_v49 = vrot.slane %v491_v48, 4 }
 0x1ed   : > { %v493_v50 = vadd.f32 %v492_v49, %v491_v48 }
 0x1ef   : > { %v494_v51 = vrot.slane %v493_v50, 2 }
 0x1f1   : > { %v495_v52 = vadd.f32 %v494_v51, %v493_v50 }
 0x1f3   : > { %v496_v53 = vrot.slane %v495_v52, 1 }
 0x1f5   : > { %v497_v54 = vadd.f32 %v496_v53, %v495_v52 }
 0x1f7   : > { %670 = vrsqrt.f32 %v497_v54  ;;  %vm500_vm4 = vcmp.eq.f32.partialorder %v497_v54, inf  ;;  %v503_v57 = vand.u32 2147483648, %v497_v54  ;;  %vm502_vm5 = vcmp.eq.f32.partialorder %v497_v54, 0.0 }
 0x204   : > { %v671_v55 = vpop.eup %670 }
 0x205   : > { %v499_v56 = vmul.f32 %v671_v55, %v497_v54 }
 0x207   : > { %v501_v58 = vsel %vm500_vm4, %v497_v54, %v499_v56 }
 0x208   : > { %v504_v59 = vsel %vm502_vm5, %v503_v57, %v501_v58 }
 0x209   : > { %v505_v60 = vmax.f32 %v504_v59, 1e-12 }
 0x20b   : > { %672 = vrcp.f32 %v505_v60 }
 0x218   : > { %v673_v0 = vpop.eup %672 }
 0x219   : > { %v508_v2 = vmul.f32 %v673_v0, %v489_v46  ;;  %v517_v3 = vmul.f32 %v673_v0, %v516_v63 }
 0x21b   : > { %509 = vst.msk [vmem:[%s409_s22] sm:$0xff] %vm418_vm2, %v508_v2  ;;  %v519_v4 = vadd.f32 %v518_v1, %v517_v3 }
 0x21d   : > { %520 = vst.msk [vmem:[%s413_s27] sm:$0xff] %vm418_vm2, %v519_v4 }
 0x21e PF: > { %s21_s15 = sadd.s32 1, %s696_s15   ;;  %s841_s13 = smov %s692_s14 }
 0x21f   : > { %p18_p5 = scmp.ge.s32.totalorder %s21_s15, 4   ;;  %s842_s14 = smov %s844_s16 }
 0x221   :  { %20 = sbr.rel (!%p18_p5) target bundleno = 2 (0x2), region = 109 }

// kernel: global_context_forward.3
= control target key start
LH: loop header
LB: loop body
LE: loop exit
PB: predicated region body
PF: predicated region fallthrough
CT: control target
= control target key end

     0   :  { %s660_s21 = smov 0   ;;  %s662_s22 = smov 0   ;;  %s716_s0 = inlined_call_operand.vmem [shape: f32[2,8,128], index: 0, kind: input, shape index: {}, may-alias: {0,6}]   ;;  %s717_s1 = inlined_call_operand.vmem [shape: f32[2,8,1], index: 1, kind: input, shape index: {}]   ;;  %s718_s2 = inlined_call_operand.vmem [shape: f32[2,8,1], index: 2, kind: input, shape index: {}]   ;;  %s719_s3 = inlined_call_operand.vmem [shape: bf16[8,8], index: 3, kind: input, shape index: {}]   ;;  %s720_s4 = inlined_call_operand.vmem [shape: bf16[8,8], index: 4, kind: input, shape index: {}]   ;;  %s721_s5 = inlined_call_operand.vmem [shape: f32[8,1], index: 5, kind: input, shape index: {}]   ;;  %s722_s6 = inlined_call_operand.vmem [shape: f32[2,8,128], index: 6, kind: output, shape index: {}, may-alias: {0,6}]  }
   0x1   :  { %s664_s23 = smov 0  }
   0x2 LB: > { %s28_s24 = sadd.s32 1, %s616_s22  ;;  %p544_p0 = scmp.ge.s32.totalorder %s620_s23, 1  ;;  %s620_s23 = sphi %s664_s23, %s16_s23   ;;  %s616_s22 = sphi %s662_s22, %s724_s22   ;;  %s612_s21 = sphi %s660_s21, %s723_s21  }
   0x3   : > { %p30_p1 = scmp.ge.s32.totalorder %s28_s24, 2  ;;  %p248_p2 = scmp.lt.s32.totalorder %s620_s23, 3 }
   0x5   : > { %s726_s24 = smov (%p30_p1, %s28_s24), 0  ;;  %p249_p3 = pnand %p544_p0, %p248_p2 }
   0x6   : > { %p290_p4 = scmp.lt.s32.totalorder (!%p249_p3), %s612_s21, 1 }
   0x7   : > { %252 = sbr.rel (%p249_p3) target bundleno = 566 (0x236), region = 44 }
   0xc   : > { %v622_v0 = vmov 0   ;;  %s728_s21 = smov (!%p290_p4, %s612_s21), 1  ;;  %v623_v3 = vmov 0.0   ;;  %vm624_vm0 = vmmov 0   ;;  %vm341_vm1 = vcmask 1043456   ;;  %v388_v18 = vld [vmem:[%s721_s5] sm:$0xff] }
   0xd   : > { %596 = vset.pattern.permute.xlu0 %v622_v0  ;;  %597 = vset.pattern.permute.xlu1 %v622_v0  ;;  %s678_s25 = sshll.u32 %s728_s21, 3  ;;  %v331_v17 = vld [vmem:[%s719_s3] sm:$0xf]  ;;  %vm337_vm2 = vcmask 64512  }
   0xe   : > { %s300_s28 = scalar_lea.vmem %s717_s1, %s678_s25  ;;  %s304_s7 = scalar_lea.vmem %s718_s2, %s678_s25  ;;  %557 = vmatprep.subr.bf16.mxu0 %v623_v3  ;;  %563 = vmatprep.subr.bf16.mxu1 %v623_v3  ;;  %v387_v28 = vld [vmem:[%s720_s4] sm:$0xf] }
   0xf   : > { %v313_v1 = vld [vmem:[%s300_s28] sm:$0xff]  ;;  %559 = vmatprep.mubr.msk.bf16.mxu0 %vm624_vm0, %v623_v3  ;;  %565 = vmatprep.mubr.msk.bf16.mxu1 %vm624_vm0, %v623_v3  ;;  %s296_s10 = scalar_lea.vmem %s716_s0, %s678_s25  ;;  %s311_s19 = scalar_lea.vmem %s722_s6, %s678_s25 }
  0x10   : > { %318 = vperm.xlu0 %596, %v313_v1   ;;  %v314_v2 = vld [vmem:[%s304_s7] sm:$0xff]  ;;  %391 = vperm.xlu1 %597, %v388_v18  }
  0x11   : > { %v315_v4 = vld [vmem:[%s296_s10] sm:$0xff] }
  0x14   : > { %334 = vperm.xlu0 %596, %v314_v2  }
  0x8b   : > { %v319_v5 = vpop.permute.xlu0 %318  ;;  %v392_v29 = vpop.permute.xlu1 %391 }
  0x8c   : > { %v321_v6 = vmul.f32 %v319_v5, %v315_v4 }
  0x8e   : > { %v322_v7 = vrot.slane %v321_v6, 4 }
  0x8f   : > { %v335_v19 = vpop.permute.xlu0 %334 }
  0x90   : > { %v323_v8 = vadd.f32 %v322_v7, %v321_v6 }
  0x92   : > { %v324_v9 = vrot.slane %v323_v8, 2 }
  0x94   : > { %v325_v10 = vadd.f32 %v324_v9, %v323_v8 }
  0x96   : > { %v326_v11 = vrot.slane %v325_v10, 1 }
  0x98   : > { %v327_v12 = vadd.f32 %v326_v11, %v325_v10 }
  0x9a   : > { %v328_v13 = vmul.f32 %v327_v12, %v319_v5 }
  0x9c   : > { %v329_v14 = vsub.f32 %v315_v4, %v328_v13 }
  0x9e   : > { %v330_v15 = vpack.c.bf16 %v329_v14, %v329_v14 }
  0xa0   : > { %v343_v16 = vsel %vm341_vm1, %v330_v15, 0 }
  0xa1   : > { %558 = vmatpush3.bf16.msra.mxu0 %v343_v16 }
  0xa4   : > { %560 = vmatmul.mubr.msk.bf16.vlgmr.msra.gmra.mxu0 %vm337_vm2, %v331_v17 }
 0x164   : > { %v379_v20 = vpop.f32.mrf.mxu0 }
 0x165   : > { %v380_v21 = vadd.f32 %v379_v20, %v335_v19 }
 0x166   : > { %v561_v22 = vpop.f32.mrf.mxu0 }
 0x167   : > { %v385_v23 = vmax.f32 %v380_v21, 0.0 }
 0x168   : > { %v382_v24 = vpop.f32.mrf.mxu0 }
 0x169   : > { %v386_v25 = vpack.c.bf16 %v385_v23, %v385_v23 }
 0x16a   : > { %v562_v26 = vpop.f32.mrf.mxu0 }
 0x16b   : > { %v398_v27 = vsel %vm341_vm1, %v386_v25, 0 }
 0x16c   : > { %564 = vmatpush3.bf16.msra.mxu1 %v398_v27 }
 0x16f   : > { %566 = vmatmul.mubr.msk.bf16.vlgmr.msra.gmra.mxu1 %vm337_vm2, %v387_v28 }
 0x22f   : > { %v434_v30 = vpop.f32.mrf.mxu1 }
 0x230   : > { %v435_v31 = vadd.f32 %v434_v30, %v392_v29 }
 0x231   : > { %v567_v32 = vpop.f32.mrf.mxu1 }
 0x232   : > { %v440_v33 = vadd.f32 %v435_v31, %v315_v4 }
 0x233   : > { %v437_v34 = vpop.f32.mrf.mxu1 }
 0x234   : > { %441 = vst [vmem:[%s311_s19] sm:$0xff] %v440_v33 }
 0x235   : > { %v568_v35 = vpop.f32.mrf.mxu1 }
 0x236 PF: > { %s16_s23 = sadd.s32 1, %s620_s23   ;;  %s723_s21 = smov %s616_s22 }
 0x237   : > { %p13_p5 = scmp.ge.s32.totalorder %s16_s23, 4   ;;  %s724_s22 = smov %s726_s24 }
 0x239   :  { %15 = sbr.rel (!%p13_p5) target bundleno = 2 (0x2), region = 80 }

</bundles_post_ra>
